<compile_context>
chip_gen: v6e
topology: v6e:2x2x1
jax: 0.10.0
libtpu: 0.0.40
codegen_flags: <defaults>
</compile_context>

<pallas_src>
import functools

import numpy as np
import jax
import jax.numpy as jnp
from jax.experimental import pallas as pl
from jax.experimental.pallas import tpu as pltpu


# ------------------------------ graph schema --------------------------------

NODE_TYPES = ("paper", "author", "subject")
NODE_IDX = {nt: i for i, nt in enumerate(NODE_TYPES)}

# Canonical etypes, ordered so (a) each destination node type forms ONE contiguous run
# along the etype grid axis (resident-accumulator pattern) and (b) consecutive steps share
# the same src node type where possible (src-feature block buffer reuse).
CANONICAL_ETYPES = (
    ("paper",   "written-by", "author"),   # dst author  (src paper)
    ("paper",   "is-about",   "subject"),  # dst subject (src paper)
    ("paper",   "citing",     "paper"),    # dst paper   (src paper)
    ("paper",   "cited",      "paper"),    # dst paper   (src paper)
    ("author",  "writing",    "paper"),    # dst paper   (src author)
    ("subject", "has",        "paper"),    # dst paper   (src subject)
)
ETYPES = tuple(e for _, e, _ in CANONICAL_ETYPES)
N_ETYPES = len(CANONICAL_ETYPES)

LANE = 128


def _round_up(x, m):
    return (x + m - 1) // m * m


def _pick_tiles(n_pad):
    """Pick (tm, tk): dst-row tile (>=2 tiles when possible -> feeds v7x's 2 TCs;
    32-granular for int8 A blocks) and src-chunk tile for the K-tiled aggregation."""
    tm = n_pad
    if n_pad >= 128:
        for cand in (256, 128, 64):
            if n_pad % cand == 0 and n_pad // cand >= 2:
                tm = cand
                break
    tk = n_pad
    for cand in (2048, 1024, 512, 256, 128):
        if n_pad % cand == 0:
            tk = cand
            break
    return tm, tk


# ------------------------------ Pallas kernel -------------------------------

def _hetero_layer_kernel(meta_ref, x_ref, w_ref, b_ref, a_ref, inv_ref,
                         o_ref, agg_ref, acc_ref, *, apply_relu):
    """Fused per-(dst-row-tile, etype, src-chunk) step of one HeteroRGCNLayer.

    meta_ref: SMEM int32 [4, n_etypes]: rows = (src_type, dst_type, first, last).
    x_ref:    [tk, f_in]    bf16  src-node feature chunk of this etype's src type.
    w_ref:    [f_in, f_out] bf16  per-etype linear weight.
    b_ref:    [1, f_out]    f32   per-etype linear bias.
    a_ref:    [tm, tk]      int8  0/1 adjacency chunk A_e[dst_tile, src_chunk].
    inv_ref:  [tm, 1]       f32   1 / in_degree (0 where in_degree == 0).
    o_ref:    [tm, f_out]         output tile for this dst node type (bf16 or f32).
    agg_ref:  [tm, f_in]    f32   scratch: running A_e @ X_src over src chunks.
    acc_ref:  [tm, f_out]   f32   scratch: running cross-etype 'sum' for this dst type.
    """
    e = pl.program_id(1)
    k = pl.program_id(2)
    k_last = pl.num_programs(2) - 1
    is_first_etype = meta_ref[2, e]
    is_last_etype = meta_ref[3, e]

    @pl.when(k == 0)
    def _():
        agg_ref[...] = jnp.zeros_like(agg_ref)

    # copy_u + sum over this src chunk: agg += A_chunk @ X_chunk  (f32 MXU accumulate).
    a = a_ref[...].astype(jnp.float32).astype(jnp.bfloat16)   # int8 0/1 -> bf16 operand
    agg_ref[...] += jnp.dot(a, x_ref[...], preferred_element_type=jnp.float32)

    @pl.when(k == k_last)
    def _finalize_etype():
        inv_d = inv_ref[...]                                   # [tm, 1], 0 where deg == 0
        mean = (agg_ref[...] * inv_d).astype(jnp.bfloat16)     # fn.mean('m', 'h')
        msg = jnp.dot(mean, w_ref[...], preferred_element_type=jnp.float32)
        # Bias only for nodes that actually received a message for this etype
        # (DGL's mean delivers nothing to zero-in-degree nodes).
        msg = msg + jnp.where(inv_d > 0.0, 1.0, 0.0) * b_ref[...]

        @pl.when(is_first_etype == 1)
        def _():
            acc_ref[...] = msg

        @pl.when(is_first_etype == 0)
        def _():
            acc_ref[...] = acc_ref[...] + msg

        @pl.when(is_last_etype == 1)
        def _():
            h = acc_ref[...]
            if apply_relu:
                h = jnp.where(h >= 0.0, h, jnp.float32(0.01) * h)
            o_ref[...] = h.astype(o_ref.dtype)


def hetero_rgcn_layer(feats, w_stack, b_stack, adj_stack, inv_deg, meta, *,
                      apply_relu, out_dtype, tile_m=None, tile_k=None):
    """One HeteroRGCNLayer as a single pallas_call.

    feats:     [n_node_types, n_pad, f_in]  bf16 (zero-padded, stacked by node type)
    w_stack:   [n_etypes, f_in, f_out]      bf16
    b_stack:   [n_etypes, 1, f_out]         f32
    adj_stack: [n_etypes, n_pad, n_pad]     int8 raw 0/1 A[dst, src]
    inv_deg:   [n_etypes, n_pad, 1]         f32  1/in_degree (0 where deg==0)
    meta:      [4, n_etypes]                int32 scalar-prefetch table
    returns:   [n_node_types, n_pad, f_out] out_dtype
    """
    n_types, n_pad, f_in = feats.shape
    n_et, f_in2, f_out = w_stack.shape
    assert f_in == f_in2 and n_et == N_ETYPES
    assert n_pad % LANE == 0 and f_in % LANE == 0 and f_out % LANE == 0

    tm_d, tk_d = _pick_tiles(n_pad)
    tm = tm_d if tile_m is None else tile_m
    tk = tk_d if tile_k is None else tile_k
    assert n_pad % tm == 0 and n_pad % tk == 0
    m_tiles, k_tiles = n_pad // tm, n_pad // tk
    grid = (m_tiles, n_et, k_tiles)

    out_bytes = np.dtype(out_dtype).itemsize
    flops = int(2 * n_et * n_pad * (n_pad * f_in + f_in * f_out))
    bytes_accessed = int(
        n_et * n_pad * n_pad                         # int8 adjacency, read once
        + 2 * m_tiles * n_et * n_pad * f_in          # bf16 X chunks (refetched per m tile)
        + 2 * m_tiles * n_et * f_in * f_out          # bf16 W (refetched per m tile)
        + 4 * m_tiles * n_et * f_out                 # f32 bias
        + 4 * n_et * n_pad                           # f32 inv-degree
        + out_bytes * n_types * n_pad * f_out)       # output

    # VMEM budget: double-buffered inputs/outputs + f32 scratch, capped for v7x's 64 MiB.
    vmem_bytes = (2 * (tk * f_in * 2 + f_in * f_out * 2 + f_out * 4
                       + tm * tk + tm * 4 + tm * f_out * out_bytes)
                  + tm * f_in * 4 + tm * f_out * 4)
    vmem_limit = int(min(max(2 * vmem_bytes, 16 << 20), 64 << 20))

    kernel = functools.partial(_hetero_layer_kernel, apply_relu=apply_relu)

    return pl.pallas_call(
        kernel,
        out_shape=jax.ShapeDtypeStruct((n_types, n_pad, f_out), out_dtype),
        grid_spec=pltpu.PrefetchScalarGridSpec(
            num_scalar_prefetch=1,
            grid=grid,
            in_specs=[
                # src-node feature chunk: node type picked from the meta table, chunk k
                pl.BlockSpec((None, tk, f_in), lambda m, e, k, meta: (meta[0, e], k, 0)),
                # per-etype weight / bias
                pl.BlockSpec((None, f_in, f_out), lambda m, e, k, meta: (e, 0, 0)),
                pl.BlockSpec((None, 1, f_out),    lambda m, e, k, meta: (e, 0, 0)),
                # per-etype int8 adjacency chunk A[dst tile m, src chunk k]
                pl.BlockSpec((None, tm, tk),      lambda m, e, k, meta: (e, m, k)),
                # per-etype reciprocal in-degree for dst tile m
                pl.BlockSpec((None, tm, 1),       lambda m, e, k, meta: (e, m, 0)),
            ],
            # Output tile picked by dst-type id: stays resident across the contiguous run
            # of etypes sharing that dst type (and across all src chunks).
            out_specs=pl.BlockSpec((None, tm, f_out),
                                   lambda m, e, k, meta: (meta[1, e], m, 0)),
            scratch_shapes=[pltpu.VMEM((tm, f_in), jnp.float32),
                            pltpu.VMEM((tm, f_out), jnp.float32)],
        ),
        compiler_params=pltpu.CompilerParams(
            dimension_semantics=("parallel", "arbitrary", "arbitrary"),
            vmem_limit_bytes=vmem_limit),
        cost_estimate=pl.CostEstimate(flops=flops, transcendentals=0,
                                      bytes_accessed=bytes_accessed),
    )(meta, feats, w_stack, b_stack, adj_stack, inv_deg)


def hetero_rgcn_forward(feat_stack, params1, params2, adj_stack, inv_deg, meta):
    w1, b1 = params1
    w2, b2 = params2
    # Layer 1 + fused leaky_relu; bf16 output is produced inside the kernel finalize,
    # so layer 2 consumes it directly (no intermediate XLA cast op / extra HBM trip).
    h = hetero_rgcn_layer(feat_stack.astype(jnp.bfloat16), w1, b1, adj_stack, inv_deg,
                          meta, apply_relu=True, out_dtype=jnp.bfloat16)
    out = hetero_rgcn_layer(h, w2, b2, adj_stack, inv_deg, meta,
                            apply_relu=False, out_dtype=jnp.float32)
    return out                                                   # [3, n_pad, f_out_pad]


# --------------------------- param / graph builders -------------------------

def xavier_uniform(key, shape):
    bound = float(np.sqrt(6.0 / (shape[0] + shape[1])))
    return jax.random.uniform(key, shape, jnp.float32, -bound, bound)


def linear_params(key, in_size, out_size):
    kw, kb = jax.random.split(key)
    bound = 1.0 / float(np.sqrt(in_size))
    W = jax.random.uniform(kw, (in_size, out_size), jnp.float32, -bound, bound)
    b = jax.random.uniform(kb, (out_size,), jnp.float32, -bound, bound)
    return W, b


def make_layer_params(key, in_size, out_size, f_in_pad, f_out_pad):
    keys = jax.random.split(key, N_ETYPES)
    w_stack = np.zeros((N_ETYPES, f_in_pad, f_out_pad), np.float32)
    b_stack = np.zeros((N_ETYPES, 1, f_out_pad), np.float32)
    for i, k in enumerate(keys):
        W, b = linear_params(k, in_size, out_size)
        w_stack[i, :in_size, :out_size] = np.array(W)
        b_stack[i, 0, :out_size] = np.array(b)
    return jnp.asarray(w_stack).astype(jnp.bfloat16), jnp.asarray(b_stack)


def build_graph_tensors(incidence, n_pad):
    """incidence: dict etype -> dense [n_dst, n_src] 0/1 numpy array."""
    adj = np.zeros((N_ETYPES, n_pad, n_pad), np.int8)
    inv_deg = np.zeros((N_ETYPES, n_pad, 1), np.float32)
    meta = np.zeros((4, N_ETYPES), np.int32)
    for i, (src, et, dst) in enumerate(CANONICAL_ETYPES):
        a = (np.asarray(incidence[et]) != 0).astype(np.int8)
        adj[i, :a.shape[0], :a.shape[1]] = a
        deg = adj[i].astype(np.float32).sum(axis=1)
        inv_deg[i, :, 0] = np.where(deg > 0.0, 1.0 / np.maximum(deg, 1.0), 0.0)
        meta[0, i] = NODE_IDX[src]
        meta[1, i] = NODE_IDX[dst]
    for i in range(N_ETYPES):
        meta[2, i] = 1 if (i == 0 or meta[1, i - 1] != meta[1, i]) else 0             # first
        meta[3, i] = 1 if (i == N_ETYPES - 1 or meta[1, i + 1] != meta[1, i]) else 0  # last
    return jnp.asarray(adj), jnp.asarray(inv_deg), jnp.asarray(meta, dtype=jnp.int32)


# ------------------------------------ main -----------------------------------

if __name__ == "__main__":
    key = jax.random.PRNGKey(0)
    n_nodes = {"paper": 24, "author": 16, "subject": 8}
    in_size, hidden_size, out_size = 16, 32, 8

    f_in_pad = _round_up(in_size, LANE)       # 128: lane-dense matmul operands/outputs
    f_hid_pad = _round_up(hidden_size, LANE)  # 128
    f_out_pad = _round_up(out_size, LANE)     # 128
    n_pad = _round_up(max(n_nodes.values()), LANE)  # 128: lane-dense A, full MXU K

    keys = jax.random.split(key, 8)

    # Synthetic incidence matrices (stand-ins for ACM.mat PvsA / PvsP / PvsL).
    PvsA = np.array(jax.random.bernoulli(keys[0], 0.3, (n_nodes["paper"], n_nodes["author"])),
                    dtype=np.float32)
    PvsP = np.array(jax.random.bernoulli(keys[1], 0.2, (n_nodes["paper"], n_nodes["paper"])),
                    dtype=np.float32)
    PvsL = np.array(jax.random.bernoulli(keys[2], 0.4, (n_nodes["paper"], n_nodes["subject"])),
                    dtype=np.float32)

    # Raw 0/1 adjacency A[dst, src] per canonical etype (mean-normalization via precomputed
    # reciprocal in-degree).
    incidence = {
        "written-by": PvsA.T,   # paper -> author
        "is-about":   PvsL.T,   # paper -> subject
        "citing":     PvsP.T,   # paper -> paper
        "cited":      PvsP,     # paper -> paper (reverse)
        "writing":    PvsA,     # author -> paper
        "has":        PvsL,     # subject -> paper
    }
    adj_stack, inv_deg, meta = build_graph_tensors(incidence, n_pad)

    # Learnable node embeddings (xavier uniform), zero-padded into a stacked layout.
    feat = np.zeros((len(NODE_TYPES), n_pad, f_in_pad), np.float32)
    for i, nt in enumerate(NODE_TYPES):
        feat[i, :n_nodes[nt], :in_size] = np.array(
            xavier_uniform(keys[3 + i], (n_nodes[nt], in_size)))
    feat = jnp.asarray(feat)

    params1 = make_layer_params(keys[6], in_size, hidden_size, f_in_pad, f_hid_pad)
    params2 = make_layer_params(keys[7], hidden_size, out_size, f_hid_pad, f_out_pad)

    out_full = hetero_rgcn_forward(feat, params1, params2, adj_stack, inv_deg, meta)
    out = out_full[NODE_IDX["paper"], :n_nodes["paper"], :out_size]
    out = jax.block_until_ready(out)

    assert out.shape == (n_nodes["paper"], out_size) and out.dtype == jnp.float32
    assert bool(jnp.all(jnp.isfinite(out)))
    print("KERNEL_OK")
</pallas_src>

<mosaic_0001>
module attributes {stable_mosaic.version = 11 : i64} {
  func.func @_hetero_layer_kernel(%arg0: i32, %arg1: i32, %arg2: i32, %arg3: memref<4x6xi32, #tpu.memory_space<smem>>, %arg4: memref<1x128x128xbf16, #tpu.memory_space<vmem>>, %arg5: memref<1x128x128xbf16, #tpu.memory_space<vmem>>, %arg6: memref<1x1x128xf32, #tpu.memory_space<vmem>>, %arg7: memref<1x64x128xi8, #tpu.memory_space<vmem>>, %arg8: memref<1x64x1xf32, #tpu.memory_space<vmem>>, %arg9: memref<1x64x128xbf16, #tpu.memory_space<vmem>>, %arg10: memref<64x128xf32, #tpu.memory_space<vmem>>, %arg11: memref<64x128xf32, #tpu.memory_space<vmem>>) attributes {dimension_semantics = [#tpu.dimension_semantics<parallel>, #tpu.dimension_semantics<arbitrary>, #tpu.dimension_semantics<arbitrary>], iteration_bounds = array<i64: 2, 6, 1>, scalar_prefetch = 1 : i64, scratch_operands = 2 : i64, tpu.core_type = #tpu.core_type<tc>, window_params = [{transform_indices = @transform_0, window_bounds = array<i64: 1, 128, 128>}, {transform_indices = @transform_1, window_bounds = array<i64: 1, 128, 128>}, {transform_indices = @transform_2, window_bounds = array<i64: 1, 1, 128>}, {transform_indices = @transform_3, window_bounds = array<i64: 1, 64, 128>}, {transform_indices = @transform_4, window_bounds = array<i64: 1, 64, 1>}, {transform_indices = @transform_5, window_bounds = array<i64: 1, 64, 128>}]} {
    %c2 = arith.constant 2 : index
    %0 = arith.index_cast %arg1 : i32 to index
    %1 = memref.load %arg3[%c2, %0] : memref<4x6xi32, #tpu.memory_space<smem>>
    %c3 = arith.constant 3 : index
    %2 = arith.index_cast %arg1 : i32 to index
    %3 = memref.load %arg3[%c3, %2] : memref<4x6xi32, #tpu.memory_space<smem>>
    %c0_i32 = arith.constant 0 : i32
    %4 = arith.cmpi eq, %arg2, %c0_i32 : i32
    %5 = arith.extui %4 : i1 to i32
    %c0_i32_0 = arith.constant 0 : i32
    %6 = arith.cmpi ne, %5, %c0_i32_0 : i32
    scf.if %6 {
      %cst_12 = arith.constant 0.000000e+00 : f32
      %20 = vector.broadcast %cst_12 : f32 to vector<64x128xf32>
      %c0_13 = arith.constant 0 : index
      %c0_14 = arith.constant 0 : index
      %21 = vector.load %arg10[%c0_13, %c0_14] : memref<64x128xf32, #tpu.memory_space<vmem>>, vector<64x128xf32>
      tpu.vector_store %arg10[%c0_13, %c0_14], %20 {strides = array<i32>} : memref<64x128xf32, #tpu.memory_space<vmem>>, vector<64x128xf32>,
    } else {
    }
    %c0 = arith.constant 0 : index
    %c0_1 = arith.constant 0 : index
    %c0_2 = arith.constant 0 : index
    %7 = vector.load %arg7[%c0, %c0_1, %c0_2] : memref<1x64x128xi8, #tpu.memory_space<vmem>>, vector<1x64x128xi8>
    %8 = vector.shape_cast %7 : vector<1x64x128xi8> to vector<64x128xi8>
    %9 = arith.sitofp %8 : vector<64x128xi8> to vector<64x128xf32>
    %10 = arith.truncf %9 : vector<64x128xf32> to vector<64x128xbf16>
    %c0_3 = arith.constant 0 : index
    %c0_4 = arith.constant 0 : index
    %11 = vector.load %arg10[%c0_3, %c0_4] : memref<64x128xf32, #tpu.memory_space<vmem>>, vector<64x128xf32>
    %c0_5 = arith.constant 0 : index
    %c0_6 = arith.constant 0 : index
    %c0_7 = arith.constant 0 : index
    %12 = vector.load %arg4[%c0_5, %c0_6, %c0_7] : memref<1x128x128xbf16, #tpu.memory_space<vmem>>, vector<1x128x128xbf16>
    %13 = vector.shape_cast %12 : vector<1x128x128xbf16> to vector<128x128xbf16>
    %cst = arith.constant dense<0.000000e+00> : vector<64x128xf32>
    %14 = tpu.matmul %10, %13, %cst {dimension_numbers = #tpu.dot_dimension_numbers<[1], [0], [0], [1], [0, 0, 1, 1], [], []>} : vector<64x128xbf16>, vector<128x128xbf16>, vector<64x128xf32> -> vector<64x128xf32>
    %15 = arith.addf %11, %14 : vector<64x128xf32>
    %c0_8 = arith.constant 0 : index
    %c0_9 = arith.constant 0 : index
    %16 = vector.load %arg10[%c0_8, %c0_9] : memref<64x128xf32, #tpu.memory_space<vmem>>, vector<64x128xf32>
    tpu.vector_store %arg10[%c0_8, %c0_9], %15 {strides = array<i32>} : memref<64x128xf32, #tpu.memory_space<vmem>>, vector<64x128xf32>,
    %c0_i32_10 = arith.constant 0 : i32
    %17 = arith.cmpi eq, %arg2, %c0_i32_10 : i32
    %18 = arith.extui %17 : i1 to i32
    %c0_i32_11 = arith.constant 0 : i32
    %19 = arith.cmpi ne, %18, %c0_i32_11 : i32
    scf.if %19 {
      %c0_12 = arith.constant 0 : index
      %c0_13 = arith.constant 0 : index
      %c0_14 = arith.constant 0 : index
      %20 = vector.load %arg8[%c0_12, %c0_13, %c0_14] : memref<1x64x1xf32, #tpu.memory_space<vmem>>, vector<1x64x1xf32>
      %21 = vector.shape_cast %20 : vector<1x64x1xf32> to vector<64x1xf32>
      %c0_15 = arith.constant 0 : index
      %c0_16 = arith.constant 0 : index
      %22 = vector.load %arg10[%c0_15, %c0_16] : memref<64x128xf32, #tpu.memory_space<vmem>>, vector<64x128xf32>
      %23 = vector.broadcast %21 : vector<64x1xf32> to vector<64x128xf32>
      %24 = arith.mulf %22, %23 : vector<64x128xf32>
      %25 = arith.truncf %24 : vector<64x128xf32> to vector<64x128xbf16>
      %c0_17 = arith.constant 0 : index
      %c0_18 = arith.constant 0 : index
      %c0_19 = arith.constant 0 : index
      %26 = vector.load %arg5[%c0_17, %c0_18, %c0_19] : memref<1x128x128xbf16, #tpu.memory_space<vmem>>, vector<1x128x128xbf16>
      %27 = vector.shape_cast %26 : vector<1x128x128xbf16> to vector<128x128xbf16>
      %cst_20 = arith.constant dense<0.000000e+00> : vector<64x128xf32>
      %28 = tpu.matmul %25, %27, %cst_20 {dimension_numbers = #tpu.dot_dimension_numbers<[1], [0], [0], [1], [0, 0, 1, 1], [], []>} : vector<64x128xbf16>, vector<128x128xbf16>, vector<64x128xf32> -> vector<64x128xf32>
      %cst_21 = arith.constant 0.000000e+00 : f32
      %29 = vector.broadcast %cst_21 : f32 to vector<64x1xf32>
      %30 = arith.cmpf ogt, %21, %29 : vector<64x1xf32>
      %cst_22 = arith.constant 1.000000e+00 : f32
      %cst_23 = arith.constant 0.000000e+00 : f32
      %31 = vector.broadcast %cst_22 : f32 to vector<64x1xf32>
      %32 = vector.broadcast %cst_23 : f32 to vector<64x1xf32>
      %33 = arith.select %30, %31, %32 : vector<64x1xi1>, vector<64x1xf32>
      %c0_24 = arith.constant 0 : index
      %c0_25 = arith.constant 0 : index
      %c0_26 = arith.constant 0 : index
      %34 = vector.load %arg6[%c0_24, %c0_25, %c0_26] : memref<1x1x128xf32, #tpu.memory_space<vmem>>, vector<1x1x128xf32>
      %35 = vector.shape_cast %34 : vector<1x1x128xf32> to vector<1x128xf32>
      %36 = vector.broadcast %33 : vector<64x1xf32> to vector<64x128xf32>
      %37 = vector.broadcast %35 : vector<1x128xf32> to vector<64x128xf32>
      %38 = arith.mulf %36, %37 : vector<64x128xf32>
      %39 = arith.addf %28, %38 : vector<64x128xf32>
      %c1_i32 = arith.constant 1 : i32
      %40 = arith.cmpi eq, %1, %c1_i32 : i32
      %41 = arith.extui %40 : i1 to i32
      %c0_i32_27 = arith.constant 0 : i32
      %42 = arith.cmpi ne, %41, %c0_i32_27 : i32
      scf.if %42 {
        %c0_32 = arith.constant 0 : index
        %c0_33 = arith.constant 0 : index
        %49 = vector.load %arg11[%c0_32, %c0_33] : memref<64x128xf32, #tpu.memory_space<vmem>>, vector<64x128xf32>
        tpu.vector_store %arg11[%c0_32, %c0_33], %39 {strides = array<i32>} : memref<64x128xf32, #tpu.memory_space<vmem>>, vector<64x128xf32>,
      } else {
      }
      %c0_i32_28 = arith.constant 0 : i32
      %43 = arith.cmpi eq, %1, %c0_i32_28 : i32
      %44 = arith.extui %43 : i1 to i32
      %c0_i32_29 = arith.constant 0 : i32
      %45 = arith.cmpi ne, %44, %c0_i32_29 : i32
      scf.if %45 {
        %c0_32 = arith.constant 0 : index
        %c0_33 = arith.constant 0 : index
        %49 = vector.load %arg11[%c0_32, %c0_33] : memref<64x128xf32, #tpu.memory_space<vmem>>, vector<64x128xf32>
        %50 = arith.addf %49, %39 : vector<64x128xf32>
        %c0_34 = arith.constant 0 : index
        %c0_35 = arith.constant 0 : index
        %51 = vector.load %arg11[%c0_34, %c0_35] : memref<64x128xf32, #tpu.memory_space<vmem>>, vector<64x128xf32>
        tpu.vector_store %arg11[%c0_34, %c0_35], %50 {strides = array<i32>} : memref<64x128xf32, #tpu.memory_space<vmem>>, vector<64x128xf32>,
      } else {
      }
      %c1_i32_30 = arith.constant 1 : i32
      %46 = arith.cmpi eq, %3, %c1_i32_30 : i32
      %47 = arith.extui %46 : i1 to i32
      %c0_i32_31 = arith.constant 0 : i32
      %48 = arith.cmpi ne, %47, %c0_i32_31 : i32
      scf.if %48 {
        %c0_32 = arith.constant 0 : index
        %c0_33 = arith.constant 0 : index
        %49 = vector.load %arg11[%c0_32, %c0_33] : memref<64x128xf32, #tpu.memory_space<vmem>>, vector<64x128xf32>
        %cst_34 = arith.constant 0.000000e+00 : f32
        %50 = vector.broadcast %cst_34 : f32 to vector<64x128xf32>
        %51 = arith.cmpf oge, %49, %50 : vector<64x128xf32>
        %cst_35 = arith.constant 0.00999999977 : f32
        %52 = vector.broadcast %cst_35 : f32 to vector<64x128xf32>
        %53 = arith.mulf %52, %49 : vector<64x128xf32>
        %54 = arith.select %51, %49, %53 : vector<64x128xi1>, vector<64x128xf32>
        %55 = arith.truncf %54 : vector<64x128xf32> to vector<64x128xbf16>
        %c0_36 = arith.constant 0 : index
        %c0_37 = arith.constant 0 : index
        %c0_38 = arith.constant 0 : index
        %56 = vector.load %arg9[%c0_36, %c0_37, %c0_38] : memref<1x64x128xbf16, #tpu.memory_space<vmem>>, vector<1x64x128xbf16>
        %57 = vector.shape_cast %56 : vector<1x64x128xbf16> to vector<64x128xbf16>
        %58 = vector.shape_cast %55 : vector<64x128xbf16> to vector<1x64x128xbf16>
        tpu.vector_store %arg9[%c0_36, %c0_37, %c0_38], %58 {strides = array<i32>} : memref<1x64x128xbf16, #tpu.memory_space<vmem>>, vector<1x64x128xbf16>,
      } else {
      }
    } else {
    }
    return
  }
  func.func @transform_0(%arg0: i32, %arg1: i32, %arg2: i32, %arg3: memref<4x6xi32, #tpu.memory_space<smem>>) -> (i32, i32, i32) {
    %c0 = arith.constant 0 : index
    %0 = arith.index_cast %arg1 : i32 to index
    %1 = memref.load %arg3[%c0, %0] : memref<4x6xi32, #tpu.memory_space<smem>>
    %c0_i32 = arith.constant 0 : i32
    %c0_i32_0 = arith.constant 0 : i32
    return %1, %arg2, %c0_i32 : i32, i32, i32
  }
  func.func @transform_1(%arg0: i32, %arg1: i32, %arg2: i32, %arg3: memref<4x6xi32, #tpu.memory_space<smem>>) -> (i32, i32, i32) {
    %c0_i32 = arith.constant 0 : i32
    %c0_i32_0 = arith.constant 0 : i32
    %c0_i32_1 = arith.constant 0 : i32
    return %arg1, %c0_i32, %c0_i32_0 : i32, i32, i32
  }
  func.func @transform_2(%arg0: i32, %arg1: i32, %arg2: i32, %arg3: memref<4x6xi32, #tpu.memory_space<smem>>) -> (i32, i32, i32) {
    %c0_i32 = arith.constant 0 : i32
    %c0_i32_0 = arith.constant 0 : i32
    %c0_i32_1 = arith.constant 0 : i32
    return %arg1, %c0_i32, %c0_i32_0 : i32, i32, i32
  }
  func.func @transform_3(%arg0: i32, %arg1: i32, %arg2: i32, %arg3: memref<4x6xi32, #tpu.memory_space<smem>>) -> (i32, i32, i32) {
    %c0_i32 = arith.constant 0 : i32
    return %arg1, %arg0, %arg2 : i32, i32, i32
  }
  func.func @transform_4(%arg0: i32, %arg1: i32, %arg2: i32, %arg3: memref<4x6xi32, #tpu.memory_space<smem>>) -> (i32, i32, i32) {
    %c0_i32 = arith.constant 0 : i32
    %c0_i32_0 = arith.constant 0 : i32
    return %arg1, %arg0, %c0_i32 : i32, i32, i32
  }
  func.func @transform_5(%arg0: i32, %arg1: i32, %arg2: i32, %arg3: memref<4x6xi32, #tpu.memory_space<smem>>) -> (i32, i32, i32) {
    %c1 = arith.constant 1 : index
    %0 = arith.index_cast %arg1 : i32 to index
    %1 = memref.load %arg3[%c1, %0] : memref<4x6xi32, #tpu.memory_space<smem>>
    %c0_i32 = arith.constant 0 : i32
    %c0_i32_0 = arith.constant 0 : i32
    return %1, %arg0, %c0_i32 : i32, i32, i32
  }
}

</mosaic_0001>

<bundles_post_ra>
// kernel: tpu_custom_call.1
= control target key start
LH: loop header
LB: loop body
LE: loop exit
PB: predicated region body
PF: predicated region fallthrough
CT: control target
= control target key end

     0   :  { %s1544_s21 = smov [#allocation5]   ;;  %s1828_s0 = inlined_call_operand.hbm [shape: s32[4,6], index: 0, kind: input, shape index: {}]   ;;  %s1829_s1 = inlined_call_operand.vmem [shape: bf16[3,128,128], index: 1, kind: input, shape index: {}]   ;;  %s1830_s2 = inlined_call_operand.vmem [shape: bf16[6,128,128], index: 2, kind: input, shape index: {}]   ;;  %s1831_s3 = inlined_call_operand.vmem [shape: f32[6,1,128], index: 3, kind: input, shape index: {}]   ;;  %s1832_s4 = inlined_call_operand.vmem [shape: s8[6,128,128], index: 4, kind: input, shape index: {}]   ;;  %s1833_s5 = inlined_call_operand.vmem [shape: f32[6,128,1], index: 5, kind: input, shape index: {}]   ;;  %s1834_s6 = inlined_call_operand.hbm [shape: bf16[3,128,128], index: 6, kind: output, shape index: {}]  }
   0x1   :  { %1841 = sst [smem:[#allocation17_spill]] %s1829_s1 }
   0x2   :  { %12 = dma.hbm_to_smem %s1828_s0, 64, %s1544_s21, [#allocation4] }
   0x3   :  { %1506 = dma.done.wait [#allocation4], 64 }
   0x4   :  { %1507 = vsyncadd [#allocation4], 4294967232 }
   0x5   :  { %14 = sfence }
   0x6   :  { %15 = vsyncpa [#allocation7], 0 }
   0x7   :  { %17 = vsyncpa [#allocation7 + $0x1], 0  ;;  %s1588_s24 = smov 0   ;;  %s1590_s25 = smov 0  }
   0x8   :  { %s1592_s26 = smov 0   ;;  %s1594_s27 = smov 0  }
   0x9   :  { %s1596_s28 = smov 0   ;;  %s1598_s29 = smov 0  }
   0xa   :  { %s1600_s30 = smov 0   ;;  %s1602_s0 = smov 0  }
   0xb LB: > { %1842 = sst [smem:[#allocation11_spill]] %s1522_s26  ;;  %s1154_s7 = sadd.s32 4294967295, %s1542_s0   ;;  %s1542_s0 = sphi %s1602_s0, %s23_s0   ;;  %s1538_s30 = sphi %s1600_s30, %s1857_s30   ;;  %s1534_s29 = sphi %s1598_s29, %s1856_s29   ;;  %s1530_s28 = sphi %s1596_s28, %s1855_s28   ;;  %s1526_s27 = sphi %s1594_s27, %s1854_s27   ;;  %s1522_s26 = sphi %s1592_s26, %s1853_s26   ;;  %s1518_s25 = sphi %s1590_s25, %s1859_s25   ;;  %s1514_s24 = sphi %s1588_s24, %s1858_s24  }
   0xc   : > { %1843 = sst [smem:[#allocation12_spill]] %s1534_s29  ;;  %s38_s8 = sadd.s32 1, %s1534_s29 }
   0xd   : > { %1844 = sst [smem:[#allocation13_spill]] %s1538_s30  ;;  %s42_s9 = sadd.s32 1, %s1538_s30 }
   0xe   : > { %p40_p0 = scmp.ge.s32.totalorder %s38_s8, 6  ;;  %s186_s10 = sshra.s32 %s1534_s29, 7 }
   0xf   : > { %s1209_s11 = sshll.u32 %s186_s10, 7  ;;  %s191_s12 = sand.u32 127, %s1534_s29 }
  0x10   : > { %s1861_s8 = smov (%p40_p0, %s38_s8), 0  ;;  %s1863_s9 = smov (!%p40_p0, %s42_s9), %s1538_s30 }
  0x11   : > { %1845 = sst [smem:[#allocation14_spill]] %s1861_s8  ;;  %s1210_s13 = sadd.s32 128, %s1209_s11 }
  0x12   : > { %s194_s14 = sshra.s32 %s1861_s8, 7  ;;  %p44_p1 = scmp.ge.s32.totalorder %s1863_s9, 2 }
  0x13   : > { %s192_s15 = sadd.s32 %s1210_s13, %s191_s12  ;;  %s1211_s17 = sshll.u32 %s194_s14, 7 }
  0x14   : > { %s193_s16 = sld [smem:[#allocation5 + %s192_s15]]  ;;  %s1865_s9 = smov (%p44_p1, %s1863_s9), 0 }
  0x15   : > { %1846 = sst [smem:[#allocation15_spill]] %s1865_s9  ;;  %s1212_s18 = sadd.s32 128, %s1211_s17 }
  0x16   : > { %s199_s19 = sand.u32 127, %s1861_s8  ;;  %s1155_s20 = sadd.s32 4294967294, %s1542_s0  }
  0x17   : > { %s200_s21 = sadd.s32 %s1212_s18, %s199_s19  ;;  %s203_s23 = ssub.s32 %s1538_s30, %s1865_s9 }
  0x18   : > { %s201_s22 = sld [smem:[#allocation5 + %s200_s21]]  ;;  %p217_p2 = scmp.ne.s32.totalorder %s1522_s26, %s1518_s25 }
  0x19   : > { %p218_p3 = scmp.eq.s32.totalorder %s1154_s7, 11  ;;  %p223_p4 = scmp.ne.s32.totalorder %s1518_s25, %s1514_s24 }
  0x1a   : > { %p224_p5 = scmp.eq.s32.totalorder %s1155_s20, 11  ;;  %p1160_p7 = scmp.ge.s32.totalorder %s1542_s0, 1 }
  0x1b   : > { %p1647_p6 = por %p218_p3, %p217_p2  ;;  %p300_p9 = scmp.lt.s32.totalorder %s1542_s0, 13 }
  0x1c   : > { %p1652_p8 = por %p224_p5, %p223_p4  ;;  %s207_s14 = sadd.s32 1, %s1522_s26 }
  0x1d   : > { %p301_p10 = pnand %p1160_p7, %p300_p9 }
  0x1e   : > { %s202_s12 = ssub.s32 %s193_s16, %s201_s22  ;;  %s1835_s7 = sand.u32 (!%p301_p10), 1, %s1518_s25  }
  0x1f   : > { %s204_s13 = sor.u32 %s203_s23, %s202_s12  ;;  %s362_s17 = sld [smem:[#allocation5 + %s1526_s27]] (!%p301_p10) }
  0x20   : > { %p205_p11 = scmp.eq.s32.totalorder %s204_s13, 0  ;;  %304 = sbr.rel (%p301_p10) target bundleno = 559 (0x22f), region = 40 }
  0x21   : > { %s1665_s18 = sshll.u32 (!%p301_p10), %s1835_s7, 5  ;;  %s415_s16 = sshra.s32 (!%p301_p10), %s1526_s27, 7 }
  0x22   : > { %s1659_s15 = scalar_select %p205_p11, %s1522_s26, %s207_s14  }
  0x23   : > { %s1668_s19 = sshll.u32 (!%p301_p10), %s415_s16, 7  ;;  %s1672_s21 = sand.u32 (!%p301_p10), 127, %s1526_s27 }
  0x24   : > { %1849 = sst [smem:[#allocation16_spill]] %s1659_s15  ;;  %s1216_s20 = sadd.s32 (!%p301_p10), 256, %s1668_s19 }
  0x25   : > { %v1545_v0 = vmov 0   ;;  %s421_s22 = sadd.s32 %s1216_s20, %s1672_s21  ;;  %s1218_s23 = sadd.s32 384, %s1668_s19  ;;  %v1546_v20 = vmov 0.0  }
  0x26   : > { %1402 = vset.pattern.permute.xlu0 %v1545_v0  ;;  %1403 = vset.pattern.permute.xlu1 %v1545_v0  ;;  %s1676_s12 = sld [smem:[#allocation5 + %s421_s22]]  ;;  %s425_s13 = sadd.s32 %s1218_s23, %s1672_s21 }
  0x27   : > { %p364_p12 = scmp.lt.s32.totalorder %s362_s17, 2  ;;  %s1679_s14 = sld [smem:[#allocation5 + %s425_s13]] }
  0x28   : > { %p374_p13 = scmp.lt.s32.totalorder %s1526_s27, 5  ;;  %s1166_s7 = sshll.u32 %s1530_s28, 1 }
  0x29   : > { %s1867_s17 = smov (!%p364_p12, %s362_s17), 2  ;;  %p385_p0 = scmp.lt.s32.totalorder %s1166_s7, 3 }
  0x2a   : > { %s1869_s27 = smov (!%p374_p13, %s1526_s27), 5  ;;  %s1213_s16 = sshll.u32 %s1867_s17, 6 }
  0x2b   : > { %s1850_s1 = sld [smem:[#allocation17_spill]]  ;;  %s1214_s22 = sshll.u32 %s1869_s27, 6 }
  0x2c   : > { %s1167_s23 = sshll.u32 %s1869_s27, 2  ;;  %s1871_s7 = smov (!%p385_p0, %s1166_s7), 3 }
  0x2d   : > { %s1696_s13 = sshll.u32 %s1530_s28, 3  ;;  %s391_s17 = sadd.s32 %s1167_s23, %s1871_s7 }
  0x2e   : > { %p398_p1 = scmp.lt.s32.totalorder %s1696_s13, 15  ;;  %s1170_s28 = sshll.u32 %s1869_s27, 4 }
  0x2f   : > { %s381_s30 = scalar_lea.vmem %s1831_s3, %s1869_s27  ;;  %s1751_s27 = scalar_lea.vmem [#allocation6], %s1665_s18 }
  0x30   : > { %s399_s26 = scalar_select %p398_p1, %s1696_s13, 15 }
  0x31   : > { %s1689_s20 = scalar_lea.vmem %s1850_s1, %s1213_s16  ;;  %s1703_s16 = scalar_lea.vmem %s1830_s2, %s1214_s22 }
  0x32   : > { %v1424_v1 = vld [vmem:[%s1689_s20 + $0x38] sm:$0xff]   ;;  %v1425_v2 = vld [vmem:[%s1689_s20 + $0x30] sm:$0xff]   ;;  %v1426_v3 = vld [vmem:[%s1689_s20 + $0x28] sm:$0xff]   ;;  %s1168_s1 = sshll.u32 %s391_s17, 3  ;;  %s401_s7 = sadd.s32 %s1170_s28, %s399_s26 }
  0x33   : > { %1276 = vmatprep.subr.bf16.mxu0 %v1424_v1  ;;  %s1708_s15 = scalar_lea.vmem %s1832_s4, %s1168_s1  ;;  %v1427_v4 = vld [vmem:[%s1689_s20 + $0x20] sm:$0xff]   ;;  %s1171_s22 = sshll.u32 %s401_s7, 3  ;;  %v1432_v7 = vld [vmem:[%s1703_s16 + $0x38] sm:$0xff]   ;;  %v1433_v10 = vld [vmem:[%s1703_s16 + $0x30] sm:$0xff]  }
  0x34   : > { %1277 = vmatpush3.bf16.msra.mxu0 %v1424_v1  ;;  %v1714_v5 = vld [vmem:[%s1708_s15] sm:$0xff]  ;;  %s1721_s1 = scalar_lea.vmem %s1833_s5, %s1171_s22  ;;  %v1428_v11 = vld [vmem:[%s1689_s20 + $0x18] sm:$0xff]   ;;  %1300 = vmatprep.subr.bf16.mxu1 %v1432_v7  ;;  %v1429_v14 = vld [vmem:[%s1689_s20 + $0x10] sm:$0xff]   ;;  %p1191_p2 = scmp.ne.s32.totalorder %s1676_s12, 1 }
  0x35   : > { %1278 = vmatprep.subr.bf16.mxu0 %v1425_v2  ;;  %v441_v6 = vunpack.c.l.s8.bf16 %v1714_v5  ;;  %v601_v8 = vld [vmem:[%s1721_s1] sm:$0xff]  ;;  %v603_v9 = vld [vmem:[%s1721_s1 + $0x10] sm:$0xff]  ;;  %v602_v12 = vld [vmem:[%s1721_s1 + $0x8] sm:$0xff]  ;;  %1301 = vmatpush3.bf16.msra.mxu1 %v1432_v7  ;;  %v442_v38 = vunpack.c.h.s8.bf16 %v1714_v5 }
  0x36   : > { %619 = vperm.xlu0 %1402, %v601_v8   ;;  %629 = vperm.xlu1 %1403, %v603_v9   ;;  %v604_v13 = vld [vmem:[%s1721_s1 + $0x18] sm:$0xff]  ;;  %vm685_vm0 = vcmp.gt.f32.partialorder %v601_v8, 0.0  ;;  %vm687_vm1 = vcmp.gt.f32.partialorder %v603_v9, 0.0  ;;  %v605_v15 = vld [vmem:[%s1721_s1 + $0x20] sm:$0xff]  ;;  %v1434_v16 = vld [vmem:[%s1703_s16 + $0x28] sm:$0xff]   ;;  %vm686_vm2 = vcmp.gt.f32.partialorder %v602_v12, 0.0 }
  0x37   : > { %1292 = vmatprep.mubr.bf16.mxu0 %v441_v6  ;;  %1302 = vmatprep.subr.bf16.mxu1 %v1433_v10  ;;  %v606_v17 = vld [vmem:[%s1721_s1 + $0x28] sm:$0xff]  ;;  %vm688_vm3 = vcmp.gt.f32.partialorder %v604_v13, 0.0  ;;  %v1435_v18 = vld [vmem:[%s1703_s16 + $0x20] sm:$0xff]   ;;  %v693_v21 = vsel %vm685_vm0, 1.0, %v1546_v20  ;;  %v694_v22 = vsel %vm686_vm2, 1.0, %v1546_v20  ;;  %v607_v23 = vld [vmem:[%s1721_s1 + $0x30] sm:$0xff] }
  0x38   : > { %1279 = vmatpush3.bf16.msra.mxu0 %v1425_v2  ;;  %v1430_v19 = vld [vmem:[%s1689_s20 + $0x8] sm:$0xff]   ;;  %v695_v24 = vsel %vm687_vm1, 1.0, %v1546_v20  ;;  %v696_v25 = vsel %vm688_vm3, 1.0, %v1546_v20  ;;  %vm689_vm4 = vcmp.gt.f32.partialorder %v605_v15, 0.0  ;;  %vm690_vm5 = vcmp.gt.f32.partialorder %v606_v17, 0.0  ;;  %v608_v26 = vld [vmem:[%s1721_s1 + $0x38] sm:$0xff] }
  0x39   : > { %1280 = vmatprep.subr.bf16.mxu0 %v1426_v3  ;;  %1303 = vmatpush3.bf16.msra.mxu1 %v1433_v10  ;;  %vm691_vm6 = vcmp.gt.f32.partialorder %v607_v23, 0.0  ;;  %vm692_vm7 = vcmp.gt.f32.partialorder %v608_v26, 0.0  ;;  %v1436_v27 = vld [vmem:[%s1703_s16 + $0x18] sm:$0xff]   ;;  %v1431_v28 = vld [vmem:[%s1689_s20] sm:$0xff]   ;;  %v1404_v29 = vpack.i.bf16 %v694_v22, %v693_v21  ;;  %v697_v30 = vsel %vm689_vm4, 1.0, %v1546_v20  ;;  %v440_v35 = vld [vmem:[%s1708_s15 + $0x8] sm:$0xff] }
  0x3a   : > { %624 = vperm.xlu0 %1402, %v602_v12   ;;  %634 = vperm.xlu1 %1403, %v604_v13   ;;  %v698_v31 = vsel %vm690_vm5, 1.0, %v1546_v20  ;;  %v1409_v32 = vpack.i.bf16 %v696_v25, %v695_v24  ;;  %v699_v33 = vsel %vm691_vm6, 1.0, %v1546_v20  ;;  %v700_v34 = vsel %vm692_vm7, 1.0, %v1546_v20  ;;  %v1437_v41 = vld [vmem:[%s1703_s16 + $0x10] sm:$0xff]   ;;  %v1438_v42 = vld [vmem:[%s1703_s16 + $0x8] sm:$0xff]   ;;  %v1439_v43 = vld [vmem:[%s1703_s16] sm:$0xff]  }
  0x3b   : > { %1304 = vmatprep.subr.bf16.mxu1 %v1434_v16  ;;  %v1414_v36 = vpack.i.bf16 %v698_v31, %v697_v30  ;;  %v1419_v37 = vpack.i.bf16 %v700_v34, %v699_v33  ;;  %v443_v39 = vunpack.c.l.s8.bf16 %v440_v35  ;;  %v444_v40 = vunpack.c.h.s8.bf16 %v440_v35 }
  0x3c   : > { %1281 = vmatpush3.bf16.msra.mxu0 %v1426_v3 }
  0x3d   : > { %1282 = vmatprep.subr.bf16.mxu0 %v1427_v4  ;;  %1305 = vmatpush3.bf16.msra.mxu1 %v1434_v16 }
  0x3e   : > { %639 = vperm.xlu0 %1402, %v605_v15   ;;  %644 = vperm.xlu1 %1403, %v606_v17  }
  0x3f   : > { %1306 = vmatprep.subr.bf16.mxu1 %v1435_v18 }
  0x40   : > { %1283 = vmatpush3.bf16.msra.mxu0 %v1427_v4 }
  0x41   : > { %1284 = vmatprep.subr.bf16.mxu0 %v1428_v11  ;;  %1307 = vmatpush3.bf16.msra.mxu1 %v1435_v18 }
  0x42   : > { %649 = vperm.xlu0 %1402, %v607_v23   ;;  %654 = vperm.xlu1 %1403, %v608_v26  }
  0x43   : > { %1308 = vmatprep.subr.bf16.mxu1 %v1436_v27 }
  0x44   : > { %1285 = vmatpush3.bf16.msra.mxu0 %v1428_v11  ;;  %v1182_v11 = vld [vmem:[%s381_s30] ss:$0 sm:$0xff] }
  0x45   : > { %1286 = vmatprep.subr.bf16.mxu0 %v1429_v14  ;;  %1309 = vmatpush3.bf16.msra.mxu1 %v1436_v27 }
  0x46   : > { %1405 = vperm.xlu0 %1402, %v1404_v29   ;;  %1410 = vperm.xlu1 %1403, %v1409_v32  }
  0x47   : > { %1310 = vmatprep.subr.bf16.mxu1 %v1437_v41 }
  0x48   : > { %1287 = vmatpush3.bf16.msra.mxu0 %v1429_v14 }
  0x49   : > { %1288 = vmatprep.subr.bf16.mxu0 %v1430_v19  ;;  %1311 = vmatpush3.bf16.msra.mxu1 %v1437_v41 }
  0x4a   : > { %1415 = vperm.xlu0 %1402, %v1414_v36   ;;  %1420 = vperm.xlu1 %1403, %v1419_v37  }
  0x4b   : > { %1312 = vmatprep.subr.bf16.mxu1 %v1438_v42 }
  0x4c   : > { %1289 = vmatpush3.bf16.msra.mxu0 %v1430_v19 }
  0x4d   : > { %1290 = vmatprep.subr.bf16.mxu0 %v1431_v28  ;;  %1313 = vmatpush3.bf16.msra.mxu1 %v1438_v42 }
  0x4e   : > { %1314 = vmatprep.subr.bf16.mxu1 %v1439_v43 }
  0x50   : > { %1291 = vmatpush3.bf16.msra.mxu0 %v1431_v28 }
  0x51   : > { %1315 = vmatpush3.bf16.msra.mxu1 %v1439_v43 }
  0x53   : > { %1293 = vmatmul.mubr.bf16.vlgmr.msra.gmra.mxu0 %v442_v38 }
  0x54   : > { %1296 = vmatprep.mubr.bf16.mxu0 %v443_v39 }
  0x5b   : > { %1297 = vmatmul.mubr.bf16.gmra.mxu0 %v444_v40 }
  0xb1   : > { %v630_v44 = vpop.permute.xlu1 %629  ;;  %v620_v45 = vpop.permute.xlu0 %619 }
  0xb5   : > { %v635_v47 = vpop.permute.xlu1 %634  ;;  %v625_v49 = vpop.permute.xlu0 %624 }
  0xb9   : > { %v645_v53 = vpop.permute.xlu1 %644  ;;  %v640_v58 = vpop.permute.xlu0 %639 }
  0xbd   : > { %v655_v63 = vpop.permute.xlu1 %654  ;;  %v650_v2 = vpop.permute.xlu0 %649 }
  0xc1   : > { %v1411_v8 = vpop.permute.xlu1 %1410  ;;  %v1406_v10 = vpop.permute.xlu0 %1405 }
  0xc2   : > { %v1412_v9 = vunpack.i.l.bf16 %v1411_v8  ;;  %v1407_v12 = vunpack.i.l.bf16 %v1406_v10  ;;  %v1413_v13 = vunpack.i.h.bf16 %v1411_v8  ;;  %v1408_v17 = vunpack.i.h.bf16 %v1406_v10 }
  0xc4   : > { %v750_v14 = vmul.f32 %v1412_v9, %v1182_v11  ;;  %v748_v19 = vmul.f32 %v1407_v12, %v1182_v11  ;;  %v751_v24 = vmul.f32 %v1413_v13, %v1182_v11  ;;  %v749_v28 = vmul.f32 %v1408_v17, %v1182_v11 }
  0xc5   : > { %v1421_v15 = vpop.permute.xlu1 %1420  ;;  %v1416_v20 = vpop.permute.xlu0 %1415 }
  0xc6   : > { %v1422_v22 = vunpack.i.l.bf16 %v1421_v15  ;;  %v1417_v26 = vunpack.i.l.bf16 %v1416_v20  ;;  %v1423_v30 = vunpack.i.h.bf16 %v1421_v15  ;;  %v1418_v34 = vunpack.i.h.bf16 %v1416_v20 }
  0xc8   : > { %v754_v32 = vmul.f32 %v1422_v22, %v1182_v11  ;;  %v752_v36 = vmul.f32 %v1417_v26, %v1182_v11  ;;  %v755_v39 = vmul.f32 %v1423_v30, %v1182_v11  ;;  %v753_v42 = vmul.f32 %v1418_v34, %v1182_v11 }
 0x113   : > { %v1294_v46 = vpop.f32.mrf.mxu0 }
 0x114   : > { %v659_v56 = vmul.f32 %v1294_v46, %v630_v44 }
 0x115   : > { %v551_v48 = vpop.f32.mrf.mxu0 }
 0x116   : > { %v657_v54 = vmul.f32 %v620_v45, %v551_v48 }
 0x117   : > { %v1295_v50 = vpop.f32.mrf.mxu0 }
 0x118   : > { %v660_v51 = vmul.f32 %v1295_v50, %v635_v47 }
 0x119   : > { %v554_v52 = vpop.f32.mrf.mxu0 }
 0x11a   : > { %v658_v55 = vmul.f32 %v625_v49, %v554_v52  ;;  %v666_v60 = vpack.c.bf16 %v660_v51, %v659_v56 }
 0x11b   : > { %v1298_v57 = vpop.f32.mrf.mxu0 }
 0x11c   : > { %v665_v59 = vpack.c.bf16 %v658_v55, %v657_v54  ;;  %v663_v5 = vmul.f32 %v1298_v57, %v650_v2 }
 0x11d   : > { %v567_v61 = vpop.f32.mrf.mxu0 }
 0x11e   : > { %1316 = vmatprep.mubr.bf16.mxu1 %v665_v59  ;;  %v661_v3 = vmul.f32 %v640_v58, %v567_v61 }
 0x11f   : > { %v1299_v62 = vpop.f32.mrf.mxu0  ;;  %1317 = vmatmul.mubr.bf16.vlgmr.msra.gmra.mxu1 %v666_v60 }
 0x120   : > { %v664_v0 = vmul.f32 %v1299_v62, %v655_v63 }
 0x121   : > { %v570_v1 = vpop.f32.mrf.mxu0 }
 0x122   : > { %v662_v4 = vmul.f32 %v645_v53, %v570_v1  ;;  %v668_v7 = vpack.c.bf16 %v664_v0, %v663_v5 }
 0x124   : > { %v667_v6 = vpack.c.bf16 %v662_v4, %v661_v3 }
 0x126   : > { %1320 = vmatprep.mubr.bf16.mxu1 %v667_v6 }
 0x127   : > { %1321 = vmatmul.mubr.bf16.gmra.mxu1 %v668_v7 }
 0x1df   : > { %v1318_v16 = vpop.f32.mrf.mxu1 }
 0x1e0   : > { %v847_v18 = vadd.f32 %v1318_v16, %v750_v14 }
 0x1e1   : > { %v838_v21 = vpop.f32.mrf.mxu1 }
 0x1e2   : > { %v839_v23 = vadd.f32 %v838_v21, %v748_v19 }
 0x1e3   : > { %v1319_v25 = vpop.f32.mrf.mxu1 }
 0x1e4   : > { %v850_v27 = vadd.f32 %v1319_v25, %v751_v24 }
 0x1e5   : > { %v841_v29 = vpop.f32.mrf.mxu1 }
 0x1e6   : > { %v842_v31 = vadd.f32 %v841_v29, %v749_v28 }
 0x1e7   : > { %v1322_v33 = vpop.f32.mrf.mxu1 }
 0x1e8   : > { %v863_v35 = vadd.f32 %v1322_v33, %v754_v32 }
 0x1e9   : > { %v854_v37 = vpop.f32.mrf.mxu1 }
 0x1ea   : > { %v855_v38 = vadd.f32 %v854_v37, %v752_v36  ;;  %872 = sbr.rel (%p1191_p2) target bundleno = 499 (0x1f3), region = 52 }
 0x1eb   : > { %v1323_v40 = vpop.f32.mrf.mxu1 }
 0x1ec   : > { %v866_v41 = vadd.f32 %v1323_v40, %v755_v39 }
 0x1ed   : > { %v857_v43 = vpop.f32.mrf.mxu1 }
 0x1ee   : > { %v858_v44 = vadd.f32 %v857_v43, %v753_v42 }
 0x1ef   : > { %873 = vst [vmem:[#allocation3 + $0x30] sm:$0xff] %v839_v23  ;;  %874 = vst [vmem:[#allocation3] sm:$0xff] %v842_v31 }
 0x1f0   : > { %875 = vst [vmem:[#allocation3 + $0x18] sm:$0xff] %v847_v18  ;;  %876 = vst [vmem:[#allocation3 + $0x10] sm:$0xff] %v850_v27 }
 0x1f1   : > { %877 = vst [vmem:[#allocation3 + $0x8] sm:$0xff] %v855_v38  ;;  %878 = vst [vmem:[#allocation3 + $0x20] sm:$0xff] %v858_v44 }
 0x1f2   : > { %879 = vst [vmem:[#allocation3 + $0x28] sm:$0xff] %v863_v35  ;;  %880 = vst [vmem:[#allocation3 + $0x38] sm:$0xff] %v866_v41 }
 0x1f3 PF: > { %p1192_p3 = scmp.ne.s32.totalorder %s1676_s12, 0 }
 0x1f5   : > { %884 = sbr.rel (%p1192_p3) target bundleno = 513 (0x201), region = 56 }
 0x1fa   : > { %v885_v45 = vld [vmem:[#allocation3 + $0x30] sm:$0xff]  ;;  %v886_v46 = vld [vmem:[#allocation3] sm:$0xff]  ;;  %v887_v47 = vld [vmem:[#allocation3 + $0x18] sm:$0xff] }
 0x1fb   : > { %v893_v48 = vadd.f32 %v885_v45, %v839_v23  ;;  %v894_v49 = vadd.f32 %v886_v46, %v842_v31  ;;  %v895_v50 = vadd.f32 %v887_v47, %v847_v18  ;;  %v888_v51 = vld [vmem:[#allocation3 + $0x10] sm:$0xff]  ;;  %v889_v52 = vld [vmem:[#allocation3 + $0x8] sm:$0xff]  ;;  %v890_v53 = vld [vmem:[#allocation3 + $0x20] sm:$0xff] }
 0x1fc   : > { %v896_v54 = vadd.f32 %v888_v51, %v850_v27  ;;  %v897_v55 = vadd.f32 %v889_v52, %v855_v38  ;;  %v898_v56 = vadd.f32 %v890_v53, %v858_v44  ;;  %v891_v57 = vld [vmem:[#allocation3 + $0x28] sm:$0xff]  ;;  %v892_v58 = vld [vmem:[#allocation3 + $0x38] sm:$0xff] }
 0x1fd   : > { %901 = vst [vmem:[#allocation3 + $0x30] sm:$0xff] %v893_v48  ;;  %902 = vst [vmem:[#allocation3] sm:$0xff] %v894_v49  ;;  %v899_v59 = vadd.f32 %v891_v57, %v863_v35  ;;  %v900_v60 = vadd.f32 %v892_v58, %v866_v41 }
 0x1fe   : > { %903 = vst [vmem:[#allocation3 + $0x18] sm:$0xff] %v895_v50  ;;  %904 = vst [vmem:[#allocation3 + $0x10] sm:$0xff] %v896_v54 }
 0x1ff   : > { %905 = vst [vmem:[#allocation3 + $0x8] sm:$0xff] %v897_v55  ;;  %906 = vst [vmem:[#allocation3 + $0x20] sm:$0xff] %v898_v56 }
 0x200   : > { %907 = vst [vmem:[#allocation3 + $0x28] sm:$0xff] %v899_v59  ;;  %908 = vst [vmem:[#allocation3 + $0x38] sm:$0xff] %v900_v60 }
 0x201 PF: > { %p1193_p4 = scmp.ne.s32.totalorder %s1679_s14, 1 }
 0x203   : > { %912 = sbr.rel (%p1193_p4) target bundleno = 532 (0x214), region = 60 }
 0x208   : > { %v913_v61 = vld [vmem:[#allocation3 + $0x30] sm:$0xff]  ;;  %v914_v62 = vld [vmem:[#allocation3] sm:$0xff]  ;;  %v915_v63 = vld [vmem:[#allocation3 + $0x18] sm:$0xff] }
 0x209   : > { %vm921_vm8 = vcmp.ge.f32.partialorder %v913_v61, 0.0  ;;  %vm922_vm9 = vcmp.ge.f32.partialorder %v914_v62, 0.0  ;;  %v929_v0 = vmul.f32 0.01, %v913_v61  ;;  %v930_v1 = vmul.f32 0.01, %v914_v62 }
 0x20a   : > { %v916_v2 = vld [vmem:[#allocation3 + $0x10] sm:$0xff]  ;;  %vm923_vm10 = vcmp.ge.f32.partialorder %v915_v63, 0.0  ;;  %v931_v3 = vmul.f32 0.01, %v915_v63  ;;  %v917_v4 = vld [vmem:[#allocation3 + $0x8] sm:$0xff]  ;;  %v918_v5 = vld [vmem:[#allocation3 + $0x20] sm:$0xff] }
 0x20b   : > { %v937_v6 = vsel %vm921_vm8, %v913_v61, %v929_v0  ;;  %v938_v7 = vsel %vm922_vm9, %v914_v62, %v930_v1  ;;  %vm924_vm11 = vcmp.ge.f32.partialorder %v916_v2, 0.0  ;;  %v932_v8 = vmul.f32 0.01, %v916_v2  ;;  %v919_v9 = vld [vmem:[#allocation3 + $0x28] sm:$0xff]  ;;  %v920_v10 = vld [vmem:[#allocation3 + $0x38] sm:$0xff] }
 0x20c   : > { %v1232_v11 = vpack.c.bf16 %v938_v7, %v937_v6  ;;  %v939_v12 = vsel %vm923_vm10, %v915_v63, %v931_v3  ;;  %vm925_vm12 = vcmp.ge.f32.partialorder %v917_v4, 0.0  ;;  %vm926_vm13 = vcmp.ge.f32.partialorder %v918_v5, 0.0 }
 0x20d   : > { %v940_v13 = vsel %vm924_vm11, %v916_v2, %v932_v8  ;;  %v933_v14 = vmul.f32 0.01, %v917_v4  ;;  %v934_v15 = vmul.f32 0.01, %v918_v5  ;;  %vm927_vm14 = vcmp.ge.f32.partialorder %v919_v9, 0.0 }
 0x20e   : > { %1233 = vst [vmem:[%s1751_s27] sm:$0xff] %v1232_v11   ;;  %v1237_v16 = vpack.c.bf16 %v940_v13, %v939_v12  ;;  %vm928_vm15 = vcmp.ge.f32.partialorder %v920_v10, 0.0  ;;  %v935_v17 = vmul.f32 0.01, %v919_v9  ;;  %v936_v18 = vmul.f32 0.01, %v920_v10 }
 0x20f   : > { %v941_v19 = vsel %vm925_vm12, %v917_v4, %v933_v14  ;;  %v942_v20 = vsel %vm926_vm13, %v918_v5, %v934_v15 }
 0x210   : > { %1249 = vst [vmem:[%s1751_s27 + $0x8] sm:$0xff] %v1237_v16   ;;  %v1242_v21 = vpack.c.bf16 %v942_v20, %v941_v19  ;;  %v943_v22 = vsel %vm927_vm14, %v919_v9, %v935_v17  ;;  %v944_v23 = vsel %vm928_vm15, %v920_v10, %v936_v18 }
 0x211   : > { %v1247_v24 = vpack.c.bf16 %v944_v23, %v943_v22 }
 0x212   : > { %1250 = vst [vmem:[%s1751_s27 + $0x10] sm:$0xff] %v1242_v21  }
 0x213   : > { %1251 = vst [vmem:[%s1751_s27 + $0x18] sm:$0xff] %v1247_v24  }
 0x214 PF: > { %s1228_s15 = sadd.s32 128, %s1668_s19  ;;  %s1009_s20 = sshll.u32 %s1751_s27, 4  ;;  %s1767_s20 = int_to_ptr.vmem [resolvable:$true] %s1009_s20 }
 0x215   : > { %s999_s18 = sadd.s32 %s1228_s15, %s1672_s21  ;;  %s1851_s19 = sand.u32 1, %s1518_s25  }
 0x216   : > { %s1324_s12 = scalar_select %p1647_p6, [#allocation5], [#allocation8] }
 0x217   : > { %s1873_s18 = smov (!%p1647_p6, %s999_s18), 0  ;;  %s1777_s21 = scalar_lea.sflag [#allocation7], %s1851_s19 }
 0x218   : > { %s1000_s14 = sld [smem:[%s1324_s12 + %s1873_s18]]  ;;  %s1448_s23 = scalar_lea.vmem %s1767_s20, 512 }
 0x219   : > { %p1449_p5 = scmp.ne.s32.totalorder %s1767_s20, %s1448_s23  ;;  %s1547_s17 = smov [#allocation6]  }
 0x21a   : > { %s1452_s1 = sshll.u32 %s1547_s17, 4  ;;  %s1453_s1 = int_to_ptr.vmem [resolvable:$false] %s1452_s1 }
 0x21b   : > { %p1450_p7 = pnand %p1449_p5, %p1647_p6  ;;  %s1454_s26 = scalar_lea.vmem %s1453_s1, 1024 }
 0x21c   : > { %p1455_p10 = scmp.lt.s32.totalorder %s1767_s20, %s1453_s1  ;;  %p1456_p11 = scmp.lt.s32.totalorder %s1454_s26, %s1448_s23 }
 0x21d   : > { %p1451_p9 = pneg %p1450_p7 }
 0x21e   : > { %s1205_s8 = sshll.u32 %s1000_s14, 4  ;;  %p1457_p12 = por %p1456_p11, %p1455_p10 }
 0x21f   : > { %s1006_s9 = sadd.s32 %s1205_s8, %s1696_s13 }
 0x220   : > { %s1206_s16 = sshll.u32 %s1006_s9, 6  ;;  %p1458_p13 = pnand %p1457_p12, %p1451_p9 }
 0x221   : > { %s1773_s22 = scalar_lea.hbm %s1834_s6, %s1206_s16 }
 0x222   : > { %1461 = shalt.err (!%p1458_p13)
}
 0x223   : > { %s1462_s13 = scalar_lea.hbm %s1773_s22, 512  ;;  %s1466_s27 = scalar_lea.hbm %s1834_s6, 3072 }
 0x224   : > { %p1463_p0 = scmp.ne.s32.totalorder %s1773_s22, %s1462_s13  ;;  %p1467_p3 = scmp.lt.s32.totalorder %s1773_s22, %s1834_s6 }
 0x225   : > { %p1468_p4 = scmp.lt.s32.totalorder %s1466_s27, %s1462_s13 }
 0x226   : > { %p1464_p1 = pnand %p1463_p0, %p1647_p6 }
 0x227   : > { %p1469_p5 = por %p1468_p4, %p1467_p3 }
 0x228   : > { %p1465_p2 = pneg %p1464_p1 }
 0x22a   : > { %p1470_p7 = pnand %p1469_p5, %p1465_p2 }
 0x22c   : > { %1473 = shalt.err (!%p1470_p7)
}
 0x22d   : > { %s1548_s12 = smov 64   ;;  %s1549_s14 = smov 4  }
 0x22e   : > { %1326 = dma.vmem_to_hbm [thread:$0]  (%p1647_p6), %s1767_s20, 512, %s1773_s22, %s1777_s21, %s1548_s12, %s1548_s12, %s1549_s14  }
 0x22f PF: > { %p1332_p9 = scmp.ge.s32.totalorder %s1542_s0, 2  ;;  %s1024_s8 = sand.u32 1, %s1514_s24  }
 0x230   : > { %s1025_s9 = scalar_lea.sflag [#allocation7], %s1024_s8 }
 0x231   : > { %p1329_p10 = pnand %p1332_p9, %p1652_p8 }
 0x233   : > { %p1330_p11 = pneg %p1329_p10 }
 0x235   : > { %1509 = dma.done.wait (%p1330_p11), %s1025_s9, 512  }
 0x236   : > { %1511 = vsyncadd (%p1330_p11), %s1025_s9, 4294966784  ;;  %s23_s0 = sadd.s32 1, %s1542_s0   ;;  %s1852_s16 = sld [smem:[#allocation11_spill]] }
 0x237   : > { %p20_p12 = scmp.ge.s32.totalorder %s23_s0, 14   ;;  %s1853_s26 = sld [smem:[#allocation16_spill]] }
 0x238   : > { %s1854_s27 = sld [smem:[#allocation12_spill]]  ;;  %s1858_s24 = smov %s1518_s25 }
 0x239   : > { %s1855_s28 = sld [smem:[#allocation13_spill]]  ;;  %22 = sbr.rel (!%p20_p12) target bundleno = 11 (0xb), region = 107 }
 0x23a   : > { %s1856_s29 = sld [smem:[#allocation14_spill]] }
 0x23b   : > { %s1857_s30 = sld [smem:[#allocation15_spill]] }
 0x23c   : > { %s1859_s25 = smov %s1852_s16 }
 0x23e   :  { %1030 = vsyncpa [#allocation7], 1 }
 0x23f   :  { %1032 = vsyncpa [#allocation7 + $0x1], 1 }

</bundles_post_ra>
